<compile_context>
chip_gen: v6e
topology: v6e:2x2x1
jax: 0.10.0
libtpu: 0.0.40
codegen_flags: <defaults>
</compile_context>

<pallas_src>
import math
import jax
import jax.numpy as jnp
from jax.experimental import pallas as pl
from jax.experimental.pallas import tpu as pltpu


# ----------------------------------------------------------------------------
# Kernel: out[b, c_tile, hw_tile] = x[b, c_tile, hw_tile] + proj[c_tile, hw_tile]
# ----------------------------------------------------------------------------
def _add_pos_emb_kernel(x_ref, proj_ref, o_ref):
    # x_ref / o_ref : (Ct, T) view of the (B, C, HW) activation (batch squeezed)
    # proj_ref      : (Ct, T) batch-invariant projected positional embedding
    o_ref[...] = x_ref[...] + proj_ref[...]


# ----------------------------------------------------------------------------
# Tile planner
# ----------------------------------------------------------------------------
def _plan_tiles(B, C, HW, itemsize, target_block_bytes=4 << 20, min_lanes=512):
    """Pick (T, Ct): lane (HW) tile and channel tile for a (Ct, T) block.

    Priorities:
      (1) blocks ~4 MiB so in/out/proj double-buffered stay well inside scoped
          VMEM on every generation (v7x has only 64 MiB physical),
      (2) lane tile a multiple of 128 and >= min_lanes before resorting to
          C-tiling (preserves DMA burst efficiency for wide-channel models),
      (3) >= 2 parallel grid steps whenever splittable (v7x megacore).
    Edge blocks that don't divide HW / C are handled by the cdiv grid
    (OOB reads padded, OOB writes masked) — safe for a pure elementwise add.
    """
    # ---- lane (HW) tile ----
    if HW <= 128:
        T = HW  # full-extent lane dim (allowed even if not 128-aligned)
    else:
        hw_aligned = (HW // 128) * 128                      # 128-multiple <= HW
        by_budget = (target_block_bytes // max(1, C * itemsize)) // 128 * 128
        floor = min(min_lanes, hw_aligned)                  # never shrink below
        T = max(128, floor, min(hw_aligned, by_budget))
        T = min(T, hw_aligned)
    n_hw = -(-HW // T)

    # ---- channel tile (only if a full-C block still blows the budget) ----
    Ct = C
    if C > 8 and C * T * itemsize > target_block_bytes:
        Ct = (target_block_bytes // max(1, T * itemsize)) // 8 * 8
        Ct = max(8, min(Ct, (C // 8) * 8))
    n_c = -(-C // Ct)

    # ---- megacore: guarantee >= 2 parallel grid steps when splittable ----
    if B * n_hw * n_c == 1 and HW >= 256:
        T = max(128, (HW // 2) // 128 * 128)

    return T, Ct


# ----------------------------------------------------------------------------
# Wrapper
# ----------------------------------------------------------------------------
def cartesian_positional_embedding(inputs_nchw, pe_nchw, weight, bias):
    """inputs_nchw: (B, C, H, W); pe_nchw: (1, 4, H, W);
    weight: (C, 4, 1, 1); bias: (C,).  Returns (B, C, H, W)."""
    B, C, H, W = inputs_nchw.shape
    HW = H * W
    dtype = inputs_nchw.dtype
    itemsize = dtype.itemsize

    # Hoist the batch-invariant 1x1 conv (4 -> C) out of the kernel: a tiny
    # f32 matmul + bias, then cast once to the activation dtype so the kernel
    # is a single-dtype add (halves vreg/DMA pressure for bf16 activations).
    w = weight.reshape(C, 4).astype(jnp.float32)
    b = bias.reshape(C, 1).astype(jnp.float32)
    pe_flat = pe_nchw.reshape(4, HW).astype(jnp.float32)
    proj = (jnp.dot(w, pe_flat, preferred_element_type=jnp.float32) + b).astype(dtype)

    # Layout plumbing only (contiguous trailing-dim reshape); lane axis = HW.
    x = inputs_nchw.reshape(B, C, HW)

    T, Ct = _plan_tiles(B, C, HW, itemsize)
    n_hw = pl.cdiv(HW, T)
    n_c = pl.cdiv(C, Ct)

    block_bytes = Ct * T * itemsize
    # x + out + proj, each double-buffered, plus slack; capped well under v7x's
    # 64 MiB physical VMEM, floored at 16 MiB.
    vmem_limit = int(min(48 << 20, max(16 << 20, 6 * block_bytes + (4 << 20))))

    cost = pl.CostEstimate(
        flops=int(B * C * HW),  # one add per element inside the kernel
        transcendentals=0,
        bytes_accessed=int(2 * B * C * HW * itemsize + C * HW * itemsize),
    )

    out = pl.pallas_call(
        _add_pos_emb_kernel,
        out_shape=jax.ShapeDtypeStruct((B, C, HW), dtype),
        grid_spec=pl.GridSpec(
            # c / hw outer, batch innermost: proj's block index is unchanged
            # across consecutive batch steps, so Pallas skips its re-DMA.
            grid=(n_c, n_hw, B),
            in_specs=[
                pl.BlockSpec((pl.Squeezed(), Ct, T),
                             lambda c, hw, bi: (bi, c, hw)),   # x tile
                pl.BlockSpec((Ct, T),
                             lambda c, hw, bi: (c, hw)),       # proj tile
            ],
            out_specs=pl.BlockSpec((pl.Squeezed(), Ct, T),
                                   lambda c, hw, bi: (bi, c, hw)),
        ),
        compiler_params=pltpu.CompilerParams(
            dimension_semantics=("parallel", "parallel", "parallel"),
            vmem_limit_bytes=vmem_limit,
        ),
        cost_estimate=cost,
    )(x, proj)

    return out.reshape(B, C, H, W)


# ----------------------------------------------------------------------------
# Parameter / buffer construction (mirrors the PyTorch module)
# ----------------------------------------------------------------------------
def build_grid(side_length):
    # torch: linspace(0,1,S+1) midpoints; torch.meshgrid default 'ij' ->
    # grid_y varies along rows, grid_x along columns; stack (x, y, 1-x, 1-y).
    coords = jnp.linspace(0.0, 1.0, side_length + 1)
    coords = 0.5 * (coords[:-1] + coords[1:])
    grid_y, grid_x = jnp.meshgrid(coords, coords, indexing="ij")
    return jnp.stack((grid_x, grid_y, 1.0 - grid_x, 1.0 - grid_y), axis=0)


def init_params(key, channels):
    # nn.Conv2d(4, channels, 1) with xavier_uniform_ weight, zero bias.
    bound = math.sqrt(6.0 / (4 + channels))
    weight = jax.random.uniform(
        key, (channels, 4, 1, 1), jnp.float32, minval=-bound, maxval=bound)
    bias = jnp.zeros((channels,), jnp.float32)
    return weight, bias


def _reference(x, pe, weight, bias):
    C = weight.shape[0]
    proj = jnp.einsum("ck,khw->chw", weight.reshape(C, 4), pe[0]) + bias[:, None, None]
    return x + proj[None]


if __name__ == "__main__":
    key = jax.random.PRNGKey(0)
    k_w, k_x, k_w2, k_x2 = jax.random.split(key, 4)

    # --- main check: B=2, C=32, S=16 (128-aligned HW) ---
    B, C, S = 2, 32, 16
    weight, bias = init_params(k_w, C)
    pe = build_grid(S)[None]                                   # (1, 4, S, S)
    x = jax.random.normal(k_x, (B, C, S, S), jnp.float32)      # NCHW input

    out = cartesian_positional_embedding(x, pe, weight, bias)
    out = jax.block_until_ready(out)
    ref = _reference(x, pe, weight, bias)
    assert out.shape == (B, C, S, S)
    assert jnp.allclose(out, ref, atol=1e-5, rtol=1e-5)

    # --- robustness check: HW (=400) not divisible by 128, B=1 ---
    B2, C2, S2 = 1, 16, 20
    weight2, bias2 = init_params(k_w2, C2)
    pe2 = build_grid(S2)[None]
    x2 = jax.random.normal(k_x2, (B2, C2, S2, S2), jnp.float32)
    out2 = jax.block_until_ready(
        cartesian_positional_embedding(x2, pe2, weight2, bias2))
    ref2 = _reference(x2, pe2, weight2, bias2)
    assert out2.shape == (B2, C2, S2, S2)
    assert jnp.allclose(out2, ref2, atol=1e-5, rtol=1e-5)

    print("KERNEL_OK")
</pallas_src>

<mosaic_0001>
module attributes {stable_mosaic.version = 11 : i64} {
  func.func @_add_pos_emb_kernel(%arg0: i32, %arg1: i32, %arg2: i32, %arg3: memref<1x32x256xf32, #tpu.memory_space<vmem>>, %arg4: memref<32x256xf32, #tpu.memory_space<vmem>>, %arg5: memref<1x32x256xf32, #tpu.memory_space<vmem>>) attributes {dimension_semantics = [#tpu.dimension_semantics<parallel>, #tpu.dimension_semantics<parallel>, #tpu.dimension_semantics<parallel>], iteration_bounds = array<i64: 1, 1, 2>, scalar_prefetch = 0 : i64, scratch_operands = 0 : i64, tpu.core_type = #tpu.core_type<tc>, window_params = [{transform_indices = @transform_0, window_bounds = array<i64: 1, 32, 256>}, {transform_indices = @transform_1, window_bounds = array<i64: 32, 256>}, {transform_indices = @transform_2, window_bounds = array<i64: 1, 32, 256>}]} {
    %c0 = arith.constant 0 : index
    %c0_0 = arith.constant 0 : index
    %c0_1 = arith.constant 0 : index
    %0 = vector.load %arg3[%c0, %c0_0, %c0_1] : memref<1x32x256xf32, #tpu.memory_space<vmem>>, vector<1x32x256xf32>
    %1 = vector.shape_cast %0 : vector<1x32x256xf32> to vector<32x256xf32>
    %c0_2 = arith.constant 0 : index
    %c0_3 = arith.constant 0 : index
    %2 = vector.load %arg4[%c0_2, %c0_3] : memref<32x256xf32, #tpu.memory_space<vmem>>, vector<32x256xf32>
    %3 = arith.addf %1, %2 : vector<32x256xf32>
    %c0_4 = arith.constant 0 : index
    %c0_5 = arith.constant 0 : index
    %c0_6 = arith.constant 0 : index
    %4 = vector.load %arg5[%c0_4, %c0_5, %c0_6] : memref<1x32x256xf32, #tpu.memory_space<vmem>>, vector<1x32x256xf32>
    %5 = vector.shape_cast %4 : vector<1x32x256xf32> to vector<32x256xf32>
    %6 = vector.shape_cast %3 : vector<32x256xf32> to vector<1x32x256xf32>
    tpu.vector_store %arg5[%c0_4, %c0_5, %c0_6], %6 {strides = array<i32>} : memref<1x32x256xf32, #tpu.memory_space<vmem>>, vector<1x32x256xf32>,
    return
  }
  func.func @transform_0(%arg0: i32, %arg1: i32, %arg2: i32) -> (i32, i32, i32) {
    %c0_i32 = arith.constant 0 : i32
    return %arg2, %arg0, %arg1 : i32, i32, i32
  }
  func.func @transform_1(%arg0: i32, %arg1: i32, %arg2: i32) -> (i32, i32) {
    %c0_i32 = arith.constant 0 : i32
    return %arg0, %arg1 : i32, i32
  }
  func.func @transform_2(%arg0: i32, %arg1: i32, %arg2: i32) -> (i32, i32, i32) {
    %c0_i32 = arith.constant 0 : i32
    return %arg2, %arg0, %arg1 : i32, i32, i32
  }
}

</mosaic_0001>

<bundles_post_ra>
// kernel: tpu_custom_call.1
= control target key start
LH: loop header
LB: loop body
LE: loop exit
PB: predicated region body
PF: predicated region fallthrough
CT: control target
= control target key end

     0   :  { %7 = vsyncpa [#allocation3], 0  ;;  %s843_s0 = inlined_call_operand.hbm [shape: f32[2,32,256], index: 0, kind: input, shape index: {}]   ;;  %s844_s1 = inlined_call_operand.hbm [shape: f32[32,256], index: 1, kind: input, shape index: {}]   ;;  %s845_s2 = inlined_call_operand.hbm [shape: f32[2,32,256], index: 2, kind: output, shape index: {}]  }
   0x1   :  { %9 = vsyncpa [#allocation3 + $0x1], 0 }
   0x2   :  { %10 = vsyncpa [#allocation6], 0 }
   0x3   :  { %11 = vsyncpa [#allocation4], 0 }
   0x4   :  { %13 = vsyncpa [#allocation4 + $0x1], 0  ;;  %s646_s9 = smov 0   ;;  %s648_s10 = smov 0  }
   0x5   :  { %s650_s11 = smov 0   ;;  %s652_s12 = smov 0  }
   0x6   :  { %s654_s13 = smov 0   ;;  %s656_s14 = smov 0  }
   0x7 LB: > { %s388_s15 = sadd.s32 4294967295, %s622_s14   ;;  %s389_s16 = sadd.s32 4294967294, %s622_s14   ;;  %s622_s14 = sphi %s656_s14, %s19_s14   ;;  %s618_s13 = sphi %s654_s13, %s865_s13   ;;  %s614_s12 = sphi %s652_s12, %s864_s12   ;;  %s610_s11 = sphi %s650_s11, %s863_s11   ;;  %s606_s10 = sphi %s648_s10, %s862_s10   ;;  %s602_s9 = sphi %s646_s9, %s861_s9  }
   0x8   : > { %p62_p0 = scmp.ne.s32.totalorder %s606_s10, %s602_s9  ;;  %p680_p1 = scmp.eq.s32.totalorder %s388_s15, 0 }
   0x9   : > { %p684_p2 = scmp.eq.s32.totalorder %s388_s15, 1  ;;  %p124_p3 = scmp.eq.s32.totalorder %s389_s16, 1 }
   0xa   : > { %p690_p4 = por %p680_p1, %p62_p0  ;;  %p390_p5 = scmp.ge.s32.totalorder %s622_s14, 1 }
   0xb   : > { %p695_p6 = por %p124_p3, %p62_p0  ;;  %p131_p7 = scmp.lt.s32.totalorder %s622_s14, 3 }
   0xc   : > { %s850_s19 = scalar_select %p690_p4, 1, 0 }
   0xd   : > { %s851_s20 = scalar_select %p695_p6, 1, 0 }
   0xe   : > { %p700_p8 = pnand %p390_p5, %p131_p7  ;;  %s624_s22 = smov [#allocation5]  }
   0xf   : > { %s149_s23 = sshll.u32 %s624_s22, 4  ;;  %s31_s25 = sadd.s32 1, %s618_s13  ;;  %s150_s23 = int_to_ptr.vmem [resolvable:$true] %s149_s23 }
  0x10   : > { %p415_p9 = pneg %p700_p8  ;;  %s495_s26 = scalar_lea.vmem %s150_s23, 1024 }
  0x11   : > { %p496_p13 = scmp.ne.s32.totalorder %s150_s23, %s495_s26  ;;  %p503_p5 = scmp.lt.s32.totalorder %s150_s23, %s150_s23 }
  0x12   : > { %p709_p11 = pnand %p415_p9, %p680_p1  ;;  %p504_p7 = scmp.lt.s32.totalorder %s495_s26, %s495_s26 }
  0x14   : > { %p486_p12 = pneg %p709_p11  ;;  %p505_p6 = por %p504_p7, %p503_p5 }
  0x16   : > { %p498_p0 = pnand %p496_p13, %p486_p12 }
  0x18   : > { %p499_p3 = pneg %p498_p0 }
  0x1a   : > { %p506_p4 = pnand %p505_p6, %p499_p3 }
  0x1c   : > { %509 = shalt.err (!%p506_p4)
}
  0x1d   : > { %s847_s27 = smov 256   ;;  %s626_s28 = smov 16  }
  0x1e   : > { %418 = dma.hbm_to_vmem [thread:$0]  (!%p709_p11), %s844_s1, 1024, %s150_s23, [#allocation6], %s847_s27, %s847_s27, %s626_s28  }
  0x1f   : > { %p32_p4 = scmp.ge.s32.totalorder %s31_s25, 2  ;;  %s49_s3 = sadd.s32 1, %s610_s11 }
  0x20   : > { %p56_p6 = scmp.ne.s32.totalorder %s610_s11, %s606_s10  ;;  %p57_p9 = scmp.eq.s32.totalorder %s622_s14, 0 }
  0x21   : > { %s867_s25 = smov (%p32_p4, %s31_s25), 0  ;;  %p428_p0 = scmp.lt.s32.totalorder %s622_s14, 2 }
  0x22   : > { %p730_p12 = por %p57_p9, %p56_p6  ;;  %p736_p13 = por %p684_p2, %p56_p6 }
  0x23   : > { %s42_s6 = ssub.s32 %s618_s13, %s867_s25  ;;  %s163_s7 = sand.u32 1, %s610_s11  }
  0x24   : > { %p47_p11 = scmp.eq.s32.totalorder %s42_s6, 0  ;;  %s393_s8 = sshll.u32 %s163_s7, 6 }
  0x25   : > { %s405_s16 = sshll.u32 %s618_s13, 10  ;;  %s167_s26 = scalar_lea.vmem [#allocation2], %s393_s8 }
  0x26   : > { %s745_s15 = scalar_select %p47_p11, %s610_s11, %s49_s3  }
  0x27   : > { %s178_s24 = scalar_lea.hbm %s843_s0, %s405_s16  ;;  %s179_s29 = sshll.u32 %s167_s26, 4  ;;  %s180_s29 = int_to_ptr.vmem [resolvable:$true] %s179_s29 }
  0x28   : > { %p753_p2 = pnand %p428_p0, %p730_p12  ;;  %s164_s30 = scalar_lea.sflag [#allocation3], %s163_s7 }
  0x29   : > { %s523_s6 = scalar_lea.vmem %s180_s29, 1024  ;;  %s627_s3 = smov [#allocation2]  }
  0x2a   : > { %p512_p3 = pneg %p753_p2  ;;  %p524_p5 = scmp.ne.s32.totalorder %s180_s29, %s523_s6 }
  0x2b   : > { %s528_s27 = sshll.u32 %s627_s3, 4  ;;  %s529_s27 = int_to_ptr.vmem [resolvable:$false] %s528_s27 }
  0x2c   : > { %p526_p7 = pnand %p524_p5, %p512_p3  ;;  %s530_s16 = scalar_lea.vmem %s529_s27, 2048 }
  0x2d   : > { %p531_p6 = scmp.lt.s32.totalorder %s180_s29, %s529_s27  ;;  %p532_p9 = scmp.lt.s32.totalorder %s530_s16, %s523_s6 }
  0x2e   : > { %p527_p4 = pneg %p526_p7 }
  0x2f   : > { %p533_p11 = por %p532_p9, %p531_p6 }
  0x31   : > { %p534_p10 = pnand %p533_p11, %p527_p4 }
  0x33   : > { %537 = shalt.err (!%p534_p10)
}
  0x34   : > { %s857_s4 = smov 256   ;;  %191 = sbr.rel (%p700_p8) target bundleno = 85 (0x55), region = 28 }
  0x35   : > { %422 = dma.hbm_to_vmem [thread:$0]  (!%p753_p2), %s178_s24, 1024, %s180_s29, %s164_s30, %s857_s4, %s857_s4, %s626_s28  }
  0x36   : > { %s767_s7 = sand.u32 (!%p700_p8), 1, %s606_s10   ;;  %p858_p10 = scmp.ne.s32.totalorder (!%p700_p8), %s850_s19, 0 }
  0x37   : > { %s397_s27 = sshll.u32 (!%p700_p8), %s767_s7, 6  ;;  %s194_s8 = scalar_lea.sflag (!%p700_p8), [#allocation3], %s767_s7 }
  0x38   : > { %s771_s22 = scalar_lea.vmem (!%p700_p8), [#allocation2], %s397_s27 }
  0x39   : > { %589 = dma.done.wait (%p858_p10), %s194_s8, 1024  }
  0x3a   : > { %591 = vsyncadd (%p858_p10), %s194_s8, 4294966272 }
  0x3b   : > { %593 = dma.done.wait (%p680_p1), [#allocation6], 1024  }
  0x3c   : > { %595 = vsyncadd (%p680_p1), [#allocation6], 4294966272  ;;  %v228_v0 = vld [vmem:[%s771_s22] sm:$0xff]  ;;  %v229_v2 = vld [vmem:[%s771_s22 + $0x8] sm:$0xff]  ;;  %s221_s19 = scalar_lea.vmem [#allocation7], %s397_s27  ;;  %s406_s17 = sshll.u32 %s614_s12, 10 }
  0x3d   : > { %v236_v1 = vld [vmem:[#allocation5] sm:$0xff]  ;;  %v237_v4 = vld [vmem:[#allocation5 + $0x8] sm:$0xff]  ;;  %v230_v5 = vld [vmem:[%s771_s22 + $0x10] sm:$0xff]  ;;  %s279_s21 = sshll.u32 %s221_s19, 4  ;;  %s795_s23 = scalar_lea.hbm %s845_s2, %s406_s17  ;;  %s790_s21 = int_to_ptr.vmem [resolvable:$true] %s279_s21 }
  0x3e   : > { %v244_v3 = vadd.f32 %v236_v1, %v228_v0  ;;  %v238_v6 = vld [vmem:[#allocation5 + $0x10] sm:$0xff]  ;;  %v245_v7 = vadd.f32 %v237_v4, %v229_v2  ;;  %v231_v9 = vld [vmem:[%s771_s22 + $0x18] sm:$0xff]  ;;  %v232_v11 = vld [vmem:[%s771_s22 + $0x20] sm:$0xff]  ;;  %s261_s24 = scalar_lea.sflag [#allocation4], %s767_s7  ;;  %s538_s26 = scalar_lea.vmem %s790_s21, 1024 }
  0x3f   : > { %v246_v8 = vadd.f32 %v238_v6, %v230_v5  ;;  %v239_v10 = vld [vmem:[#allocation5 + $0x18] sm:$0xff]  ;;  %v240_v13 = vld [vmem:[#allocation5 + $0x20] sm:$0xff]  ;;  %v233_v14 = vld [vmem:[%s771_s22 + $0x28] sm:$0xff]  ;;  %p539_p1 = scmp.ne.s32.totalorder %s790_s21, %s538_s26  ;;  %s628_s29 = smov [#allocation7]  }
  0x40   : > { %252 = vst [vmem:[%s221_s19] sm:$0xff] %v244_v3  ;;  %v247_v12 = vadd.f32 %v239_v10, %v231_v9  ;;  %v241_v15 = vld [vmem:[#allocation5 + $0x28] sm:$0xff]  ;;  %253 = vst [vmem:[%s221_s19 + $0x8] sm:$0xff] %v245_v7  ;;  %v248_v16 = vadd.f32 %v240_v13, %v232_v11  ;;  %v234_v18 = vld [vmem:[%s771_s22 + $0x30] sm:$0xff]  ;;  %s542_s18 = sshll.u32 %s628_s29, 4  ;;  %s543_s18 = int_to_ptr.vmem [resolvable:$false] %s542_s18 }
  0x41   : > { %254 = vst [vmem:[%s221_s19 + $0x10] sm:$0xff] %v246_v8  ;;  %v249_v17 = vadd.f32 %v241_v15, %v233_v14  ;;  %v242_v19 = vld [vmem:[#allocation5 + $0x30] sm:$0xff]  ;;  %v235_v20 = vld [vmem:[%s771_s22 + $0x38] sm:$0xff]  ;;  %p540_p8 = pnand %p539_p1, %p736_p13  ;;  %s544_s30 = scalar_lea.vmem %s543_s18, 2048 }
  0x42   : > { %255 = vst [vmem:[%s221_s19 + $0x18] sm:$0xff] %v247_v12  ;;  %v250_v21 = vadd.f32 %v242_v19, %v234_v18  ;;  %v243_v22 = vld [vmem:[#allocation5 + $0x38] sm:$0xff]  ;;  %256 = vst [vmem:[%s221_s19 + $0x20] sm:$0xff] %v248_v16  ;;  %p545_p0 = scmp.lt.s32.totalorder %s790_s21, %s543_s18  ;;  %p546_p2 = scmp.lt.s32.totalorder %s544_s30, %s538_s26 }
  0x43   : > { %257 = vst [vmem:[%s221_s19 + $0x28] sm:$0xff] %v249_v17  ;;  %v251_v23 = vadd.f32 %v243_v22, %v235_v20  ;;  %p541_p12 = pneg %p540_p8 }
  0x44   : > { %258 = vst [vmem:[%s221_s19 + $0x30] sm:$0xff] %v250_v21  ;;  %p547_p3 = por %p546_p2, %p545_p0 }
  0x45   : > { %259 = vst [vmem:[%s221_s19 + $0x38] sm:$0xff] %v251_v23 }
  0x46   : > { %p548_p5 = pnand %p547_p3, %p541_p12 }
  0x48   : > { %551 = shalt.err (!%p548_p5)
}
  0x49   : > { %s552_s6 = scalar_lea.hbm %s795_s23, 1024  ;;  %s556_s4 = scalar_lea.hbm %s845_s2, 2048 }
  0x4a   : > { %p553_p7 = scmp.ne.s32.totalorder %s795_s23, %s552_s6  ;;  %p557_p9 = scmp.lt.s32.totalorder %s795_s23, %s845_s2 }
  0x4b   : > { %p558_p11 = scmp.lt.s32.totalorder %s556_s4, %s552_s6 }
  0x4c   : > { %p554_p4 = pnand %p553_p7, %p736_p13 }
  0x4d   : > { %p559_p10 = por %p558_p11, %p557_p9 }
  0x4e   : > { %p555_p6 = pneg %p554_p4 }
  0x50   : > { %p560_p1 = pnand %p559_p10, %p555_p6 }
  0x52   : > { %563 = shalt.err (!%p560_p1)
}
  0x53   : > { %s629_s22 = smov 256   ;;  %s630_s19 = smov 16  }
  0x54   : > { %413 = dma.vmem_to_hbm [thread:$0]  (%p736_p13), %s790_s21, 1024, %s795_s23, %s261_s24, %s629_s22, %s629_s22, %s630_s19  }
  0x55 PF: > { %s294_s17 = sand.u32 1, %s602_s9   ;;  %p859_p8 = scmp.ne.s32.totalorder %s851_s20, 0 }
  0x56   : > { %p860_p12 = scmp.ge.s32.totalorder %s622_s14, 2  ;;  %s295_s12 = scalar_lea.sflag [#allocation4], %s294_s17 }
  0x58   : > { %p424_p0 = pnand %p860_p12, %p859_p8 }
  0x5a   : > { %p425_p2 = pneg %p424_p0 }
  0x5c   : > { %597 = dma.done.wait (%p425_p2), %s295_s12, 1024  }
  0x5d   : > { %599 = vsyncadd (%p425_p2), %s295_s12, 4294966272  ;;  %s19_s14 = sadd.s32 1, %s622_s14   ;;  %s861_s9 = smov %s606_s10 }
  0x5e   : > { %p16_p3 = scmp.ge.s32.totalorder %s19_s14, 4   ;;  %s862_s10 = smov %s610_s11 }
  0x5f   : > { %s863_s11 = smov %s745_s15  ;;  %s864_s12 = smov %s618_s13 }
  0x60   : > { %s865_s13 = smov %s867_s25  ;;  %18 = sbr.rel (!%p16_p3) target bundleno = 7 (0x7), region = 78 }
  0x65   :  { %300 = vsyncpa [#allocation3], 1 }
  0x66   :  { %302 = vsyncpa [#allocation3 + $0x1], 1 }
  0x67   :  { %303 = vsyncpa [#allocation6], 1 }
  0x68   :  { %304 = vsyncpa [#allocation4], 1 }
  0x69   :  { %306 = vsyncpa [#allocation4 + $0x1], 1 }

</bundles_post_ra>
